<compile_context>
chip_gen: v7x
topology: tpu7x:2x2x1
jax: 0.10.0
libtpu: 0.0.40
codegen_flags: <defaults>
</compile_context>

<pallas_src>
import jax
import jax.numpy as jnp
from jax import lax
from jax.experimental import pallas as pl
from jax.experimental.pallas import tpu as pltpu


def _round_up(x, m):
    return ((x + m - 1) // m) * m


def fusion_kernel(img_ref, w_imgT_ref,            # streamed over K (bf16, lane-dense)
                  b_img_ref,                      # resident (f32)
                  di_ref, w_di_ref, b_di_ref,     # resident demo+icd packed (f32)
                  w_fused_ref, b_fused_ref,       # resident fused weights (f32)
                  out_ref,
                  acc_ref, feat_ref):             # VMEM scratch (f32)
    k = pl.program_id(0)

    @pl.when(k == 0)
    def _init():
        acc_ref[...] = jnp.zeros_like(acc_ref)
        # Zero once so the padded contraction columns (3*mf .. 128) stay zero.
        feat_ref[...] = jnp.zeros_like(feat_ref)

    # Image-branch partial matmul.  w_img is streamed transposed (mf, tk) so the
    # dominant stream is lane-dense; the contraction is A @ B^T on the MXU with
    # f32 accumulation.
    acc_ref[...] += lax.dot_general(
        img_ref[...], w_imgT_ref[...],
        dimension_numbers=(((1,), (1,)), ((), ())),
        preferred_element_type=jnp.float32)

    @pl.when(k == pl.num_programs(0) - 1)
    def _epilogue():
        mf = acc_ref.shape[1]
        di_w = w_di_ref.shape[1]           # == 2*mf  ([demo_ft, icd_ft])

        # Image branch bias + ReLU (f32 elementwise).
        img_ft = jnp.maximum(acc_ref[...] + b_img_ref[...], 0.0)

        # demo + icd branches in ONE MXU push:
        #   [demo, icd] @ blockdiag(w_demo, w_icd) == [demo@w_demo, icd@w_icd]
        di_ft = jnp.dot(di_ref[...], w_di_ref[...],
                        preferred_element_type=jnp.float32) + b_di_ref[...]

        # concat([img_ft, demo_ft, icd_ft]) into the 128-padded contraction
        # scratch (padded cols already zero), then a single fused MXU push.
        feat_ref[:, 0:mf] = img_ft
        feat_ref[:, mf:mf + di_w] = di_ft

        out = jnp.dot(feat_ref[...], w_fused_ref[...],
                      preferred_element_type=jnp.float32) + b_fused_ref[...]
        out_ref[...] = out.astype(out_ref.dtype)


def prepare_fusion_params(params, num_classes, *, tile_k=8192,
                          stream_dtype=jnp.bfloat16):
    """One-time preparation: pre-transpose / pad / cast the weights so no
    per-call HBM pass is spent reformatting the dominant tensors."""
    w_img, b_img = params["w_img"], params["b_img"]
    w_demo, b_demo = params["w_demo"], params["b_demo"]
    w_icd, b_icd = params["w_icd"], params["b_icd"]
    w_fused, b_fused = params["w_fused"], params["b_fused"]

    K, mf = w_img.shape
    demo_ftrs, icd_ftrs = w_demo.shape[0], w_icd.shape[0]
    # The torch module's concat/Linear dims require all branch widths == min_feat.
    assert w_demo.shape[1] == mf and w_icd.shape[1] == mf, "branch widths must match"
    assert w_fused.shape[0] == 3 * mf, "fused_output expects 3*min_feat input width"

    # ---- K tiling: split K into n_k near-equal 128-aligned tiles (minimal pad).
    K_128 = _round_up(K, 128)
    n_k = pl.cdiv(K_128, _round_up(tile_k, 128))
    tk = _round_up(pl.cdiv(K_128, n_k), 128)
    K_pad = n_k * tk

    FEAT_PAD = _round_up(3 * mf, 128)        # fused contraction padded to 128
    N_pad = _round_up(num_classes, 128)      # lane-dense output store
    DI = demo_ftrs + icd_ftrs
    DI_pad = _round_up(DI, 128)

    # Dominant stream, lane-dense (K on the lane axis), cast once to bf16.
    w_imgT = jnp.zeros((mf, K_pad), stream_dtype).at[:, :K].set(
        w_img.T.astype(stream_dtype))

    # Block-diagonal demo/icd weight: exact packing (zeros contribute nothing).
    w_di = jnp.zeros((DI_pad, 2 * mf), jnp.float32)
    w_di = w_di.at[:demo_ftrs, :mf].set(w_demo.astype(jnp.float32))
    w_di = w_di.at[demo_ftrs:DI, mf:].set(w_icd.astype(jnp.float32))
    b_di = jnp.concatenate([b_demo.reshape(1, mf), b_icd.reshape(1, mf)],
                           axis=1).astype(jnp.float32)

    w_fused_p = jnp.zeros((FEAT_PAD, N_pad), jnp.float32).at[
        :3 * mf, :num_classes].set(w_fused.astype(jnp.float32))
    b_fused_p = jnp.zeros((1, N_pad), jnp.float32).at[:, :num_classes].set(
        b_fused.reshape(1, -1).astype(jnp.float32))

    return dict(
        w_imgT=w_imgT, b_img=b_img.reshape(1, mf).astype(jnp.float32),
        w_di=w_di, b_di=b_di, w_fused=w_fused_p, b_fused=b_fused_p,
        K=K, K_pad=K_pad, tk=tk, n_k=n_k, mf=mf,
        DI=DI, DI_pad=DI_pad, FEAT_PAD=FEAT_PAD, N_pad=N_pad,
        num_classes=num_classes, stream_dtype=stream_dtype,
    )


def fusion_model_v2_forward(image, demo_feat, icd_feat, prep):
    """Forward pass of Fusion_Modelv2 (both demo and icd branches present)."""
    B = image.shape[0]
    K, K_pad, tk, n_k = prep["K"], prep["K_pad"], prep["tk"], prep["n_k"]
    mf, DI, DI_pad = prep["mf"], prep["DI"], prep["DI_pad"]
    FEAT_PAD, N_pad = prep["FEAT_PAD"], prep["N_pad"]
    num_classes = prep["num_classes"]
    stream_dtype = prep["stream_dtype"]

    B_pad = _round_up(B, 16)        # 16-sublane packing for the bf16 image stream

    # Per-call work on the big activation: one fused reshape+cast; pad only if
    # the shapes actually require it (matches torch .view(B, -1)).
    img_flat = image.reshape(B, -1).astype(stream_dtype)
    assert img_flat.shape[1] == K, "image K does not match prepared params"
    if (B_pad, K_pad) != (B, K):
        img_p = jnp.zeros((B_pad, K_pad), stream_dtype).at[:B, :K].set(img_flat)
    else:
        img_p = img_flat

    di = jnp.concatenate([demo_feat, icd_feat], axis=1).astype(jnp.float32)
    di_p = jnp.zeros((B_pad, DI_pad), jnp.float32).at[:B, :DI].set(di)

    # Advisory cost estimate.
    flops = (2 * B_pad * K_pad * mf
             + 2 * B_pad * DI_pad * (2 * mf)
             + 2 * B_pad * FEAT_PAD * N_pad)
    bytes_accessed = ((B_pad * K_pad + mf * K_pad) * 2              # bf16 streams
                      + (B_pad * DI_pad + DI_pad * 2 * mf
                         + FEAT_PAD * N_pad + B_pad * N_pad) * 4)   # f32 residents

    grid_spec = pltpu.PrefetchScalarGridSpec(
        num_scalar_prefetch=0,
        grid=(n_k,),
        in_specs=[
            pl.BlockSpec((B_pad, tk), lambda k: (0, k)),        # image (streamed)
            pl.BlockSpec((mf, tk), lambda k: (0, k)),           # w_img^T (streamed, lane-dense)
            pl.BlockSpec((1, mf), lambda k: (0, 0)),            # b_img (resident)
            pl.BlockSpec((B_pad, DI_pad), lambda k: (0, 0)),    # [demo, icd] (resident)
            pl.BlockSpec((DI_pad, 2 * mf), lambda k: (0, 0)),   # blockdiag(w_demo, w_icd)
            pl.BlockSpec((1, 2 * mf), lambda k: (0, 0)),        # [b_demo, b_icd]
            pl.BlockSpec((FEAT_PAD, N_pad), lambda k: (0, 0)),  # w_fused (padded)
            pl.BlockSpec((1, N_pad), lambda k: (0, 0)),         # b_fused (padded)
        ],
        out_specs=pl.BlockSpec((B_pad, N_pad), lambda k: (0, 0)),
        scratch_shapes=[
            pltpu.VMEM((B_pad, mf), jnp.float32),        # image-branch accumulator
            pltpu.VMEM((B_pad, FEAT_PAD), jnp.float32),  # 128-padded fused features
        ],
    )

    out_padded = pl.pallas_call(
        fusion_kernel,
        out_shape=jax.ShapeDtypeStruct((B_pad, N_pad), jnp.float32),
        grid_spec=grid_spec,
        compiler_params=pltpu.CompilerParams(
            dimension_semantics=("arbitrary",),          # K is a reduction axis
            vmem_limit_bytes=32 * 1024 * 1024,           # plenty; safe on v7x (64 MiB phys)
        ),
        cost_estimate=pl.CostEstimate(flops=flops, transcendentals=0,
                                      bytes_accessed=bytes_accessed),
    )(img_p, prep["w_imgT"], prep["b_img"],
      di_p, prep["w_di"], prep["b_di"],
      prep["w_fused"], prep["b_fused"])

    # Padded batch rows (B..B_pad) contain ReLU(b_img)-derived garbage by
    # construction; they are discarded by this slice — never read padded rows.
    return out_padded[:B, :num_classes]


def init_linear(key, fan_in, fan_out):
    # Mimic torch.nn.Linear default init: U(-1/sqrt(fan_in), 1/sqrt(fan_in)).
    k = 1.0 / jnp.sqrt(jnp.float32(fan_in))
    kw, kb = jax.random.split(key)
    w = jax.random.uniform(kw, (fan_in, fan_out), jnp.float32, -k, k)
    b = jax.random.uniform(kb, (1, fan_out), jnp.float32, -k, k)
    return w, b


def reference_forward_f32(image, demo_feat, icd_feat, params):
    """Pure-JAX f32 reference matching the torch forward exactly."""
    B = image.shape[0]
    x = image.reshape(B, -1)
    img_ft = jnp.maximum(x @ params["w_img"] + params["b_img"], 0.0)
    demo_ft = demo_feat @ params["w_demo"] + params["b_demo"]
    icd_ft = icd_feat @ params["w_icd"] + params["b_icd"]
    fused = jnp.concatenate([img_ft, demo_ft, icd_ft], axis=1)
    return fused @ params["w_fused"] + params["b_fused"]


def reference_forward_bf16stream(image, demo_feat, icd_feat, params):
    """Reference that streams the image branch in bf16 (same as the kernel)."""
    B = image.shape[0]
    x = image.reshape(B, -1).astype(jnp.bfloat16)
    w_img = params["w_img"].astype(jnp.bfloat16)
    img_ft = jnp.maximum(
        jnp.dot(x, w_img, preferred_element_type=jnp.float32) + params["b_img"], 0.0)
    demo_ft = demo_feat @ params["w_demo"] + params["b_demo"]
    icd_ft = icd_feat @ params["w_icd"] + params["b_icd"]
    fused = jnp.concatenate([img_ft, demo_ft, icd_ft], axis=1)
    return fused @ params["w_fused"] + params["b_fused"]


if __name__ == "__main__":
    # Small shapes consistent with the module: both demo_ftrs and icd_ftrs given.
    B, C, H, W = 2, 4, 16, 16
    model_ftrs, demo_ftrs, icd_ftrs = 32, 48, 64
    min_feat = min(model_ftrs, demo_ftrs, icd_ftrs)   # = 32 (== model_ftrs, as the
    # torch concat/Linear dims implicitly require)
    num_classes = 8

    key = jax.random.PRNGKey(0)
    k_img, k_demo, k_icd, k_in1, k_in2, k_in3, k_fused = jax.random.split(key, 7)

    image = jax.random.normal(k_in1, (B, C, H, W), jnp.float32)
    demo_feat = jax.random.normal(k_in2, (B, demo_ftrs), jnp.float32)
    icd_feat = jax.random.normal(k_in3, (B, icd_ftrs), jnp.float32)

    w_img, b_img = init_linear(k_img, C * H * W, model_ftrs)
    w_demo, b_demo = init_linear(k_demo, demo_ftrs, min_feat)
    w_icd, b_icd = init_linear(k_icd, icd_ftrs, min_feat)
    w_fused, b_fused = init_linear(k_fused, min_feat * 3, num_classes)

    params = dict(w_img=w_img, b_img=b_img,
                  w_demo=w_demo, b_demo=b_demo,
                  w_icd=w_icd, b_icd=b_icd,
                  w_fused=w_fused, b_fused=b_fused)

    prep = prepare_fusion_params(params, num_classes, tile_k=8192)
    out = fusion_model_v2_forward(image, demo_feat, icd_feat, prep)
    out = jax.block_until_ready(out)
    assert out.shape == (B, num_classes)

    # Tight check vs a reference that streams the image branch in bf16 (kernel parity).
    ref_bf16 = reference_forward_bf16stream(image, demo_feat, icd_feat, params)
    diff_bf16 = float(jnp.max(jnp.abs(out - ref_bf16)))
    assert jnp.allclose(out, ref_bf16, atol=1e-2, rtol=1e-2), (
        "mismatch vs bf16-stream reference: max abs diff = %f" % diff_bf16)

    # Looser check vs the true f32 module numerics (bounds bf16-streaming error).
    ref_f32 = reference_forward_f32(image, demo_feat, icd_feat, params)
    diff_f32 = float(jnp.max(jnp.abs(out - ref_f32)))
    assert jnp.allclose(out, ref_f32, atol=5e-2, rtol=5e-2), (
        "mismatch vs f32 reference: max abs diff = %f" % diff_f32)

    print("KERNEL_OK")
</pallas_src>

<mosaic_0001>
module attributes {stable_mosaic.version = 11 : i64} {
  func.func @fusion_kernel(%arg0: i32, %arg1: memref<16x1024xbf16, #tpu.memory_space<vmem>>, %arg2: memref<32x1024xbf16, #tpu.memory_space<vmem>>, %arg3: memref<1x32xf32, #tpu.memory_space<vmem>>, %arg4: memref<16x128xf32, #tpu.memory_space<vmem>>, %arg5: memref<128x64xf32, #tpu.memory_space<vmem>>, %arg6: memref<1x64xf32, #tpu.memory_space<vmem>>, %arg7: memref<128x128xf32, #tpu.memory_space<vmem>>, %arg8: memref<1x128xf32, #tpu.memory_space<vmem>>, %arg9: memref<16x128xf32, #tpu.memory_space<vmem>>, %arg10: memref<16x32xf32, #tpu.memory_space<vmem>>, %arg11: memref<16x128xf32, #tpu.memory_space<vmem>>) attributes {dimension_semantics = [#tpu.dimension_semantics<arbitrary>], iteration_bounds = array<i64: 1>, scalar_prefetch = 0 : i64, scratch_operands = 2 : i64, tpu.core_type = #tpu.core_type<tc>, window_params = [{transform_indices = @transform_0, window_bounds = array<i64: 16, 1024>}, {transform_indices = @transform_1, window_bounds = array<i64: 32, 1024>}, {pipeline_mode = #tpu.pipeline_mode<synchronous>, transform_indices = @transform_2, window_bounds = array<i64: 1, 32>}, {pipeline_mode = #tpu.pipeline_mode<synchronous>, transform_indices = @transform_3, window_bounds = array<i64: 16, 128>}, {pipeline_mode = #tpu.pipeline_mode<synchronous>, transform_indices = @transform_4, window_bounds = array<i64: 128, 64>}, {pipeline_mode = #tpu.pipeline_mode<synchronous>, transform_indices = @transform_5, window_bounds = array<i64: 1, 64>}, {pipeline_mode = #tpu.pipeline_mode<synchronous>, transform_indices = @transform_6, window_bounds = array<i64: 128, 128>}, {pipeline_mode = #tpu.pipeline_mode<synchronous>, transform_indices = @transform_7, window_bounds = array<i64: 1, 128>}, {pipeline_mode = #tpu.pipeline_mode<synchronous>, transform_indices = @transform_8, window_bounds = array<i64: 16, 128>}]} {
    %c0_i32 = arith.constant 0 : i32
    %0 = arith.cmpi eq, %arg0, %c0_i32 : i32
    %1 = arith.extui %0 : i1 to i32
    %c0_i32_0 = arith.constant 0 : i32
    %2 = arith.cmpi ne, %1, %c0_i32_0 : i32
    scf.if %2 {
      %cst_10 = arith.constant 0.000000e+00 : f32
      %12 = vector.broadcast %cst_10 : f32 to vector<16x32xf32>
      %c0_11 = arith.constant 0 : index
      %c0_12 = arith.constant 0 : index
      %13 = vector.load %arg10[%c0_11, %c0_12] : memref<16x32xf32, #tpu.memory_space<vmem>>, vector<16x32xf32>
      tpu.vector_store %arg10[%c0_11, %c0_12], %12 {strides = array<i32>} : memref<16x32xf32, #tpu.memory_space<vmem>>, vector<16x32xf32>,
      %cst_13 = arith.constant 0.000000e+00 : f32
      %14 = vector.broadcast %cst_13 : f32 to vector<16x128xf32>
      %c0_14 = arith.constant 0 : index
      %c0_15 = arith.constant 0 : index
      %15 = vector.load %arg11[%c0_14, %c0_15] : memref<16x128xf32, #tpu.memory_space<vmem>>, vector<16x128xf32>
      tpu.vector_store %arg11[%c0_14, %c0_15], %14 {strides = array<i32>} : memref<16x128xf32, #tpu.memory_space<vmem>>, vector<16x128xf32>,
    } else {
    }
    %c0 = arith.constant 0 : index
    %c0_1 = arith.constant 0 : index
    %3 = vector.load %arg10[%c0, %c0_1] : memref<16x32xf32, #tpu.memory_space<vmem>>, vector<16x32xf32>
    %c0_2 = arith.constant 0 : index
    %c0_3 = arith.constant 0 : index
    %4 = vector.load %arg1[%c0_2, %c0_3] : memref<16x1024xbf16, #tpu.memory_space<vmem>>, vector<16x1024xbf16>
    %c0_4 = arith.constant 0 : index
    %c0_5 = arith.constant 0 : index
    %5 = vector.load %arg2[%c0_4, %c0_5] : memref<32x1024xbf16, #tpu.memory_space<vmem>>, vector<32x1024xbf16>
    %cst = arith.constant dense<0.000000e+00> : vector<16x32xf32>
    %6 = tpu.matmul %4, %5, %cst {dimension_numbers = #tpu.dot_dimension_numbers<[1], [1], [0], [0], [0, 0, 1, 0], [], []>} : vector<16x1024xbf16>, vector<32x1024xbf16>, vector<16x32xf32> -> vector<16x32xf32>
    %7 = arith.addf %3, %6 : vector<16x32xf32>
    %c0_6 = arith.constant 0 : index
    %c0_7 = arith.constant 0 : index
    %8 = vector.load %arg10[%c0_6, %c0_7] : memref<16x32xf32, #tpu.memory_space<vmem>>, vector<16x32xf32>
    tpu.vector_store %arg10[%c0_6, %c0_7], %7 {strides = array<i32>} : memref<16x32xf32, #tpu.memory_space<vmem>>, vector<16x32xf32>,
    %c0_i32_8 = arith.constant 0 : i32
    %9 = arith.cmpi eq, %arg0, %c0_i32_8 : i32
    %10 = arith.extui %9 : i1 to i32
    %c0_i32_9 = arith.constant 0 : i32
    %11 = arith.cmpi ne, %10, %c0_i32_9 : i32
    scf.if %11 {
      %c0_10 = arith.constant 0 : index
      %c0_11 = arith.constant 0 : index
      %12 = vector.load %arg10[%c0_10, %c0_11] : memref<16x32xf32, #tpu.memory_space<vmem>>, vector<16x32xf32>
      %c0_12 = arith.constant 0 : index
      %c0_13 = arith.constant 0 : index
      %13 = vector.load %arg3[%c0_12, %c0_13] : memref<1x32xf32, #tpu.memory_space<vmem>>, vector<1x32xf32>
      %14 = vector.broadcast %13 : vector<1x32xf32> to vector<16x32xf32>
      %15 = arith.addf %12, %14 : vector<16x32xf32>
      %cst_14 = arith.constant 0.000000e+00 : f32
      %16 = vector.broadcast %cst_14 : f32 to vector<16x32xf32>
      %17 = arith.maximumf %15, %16 : vector<16x32xf32>
      %c0_15 = arith.constant 0 : index
      %c0_16 = arith.constant 0 : index
      %18 = vector.load %arg4[%c0_15, %c0_16] : memref<16x128xf32, #tpu.memory_space<vmem>>, vector<16x128xf32>
      %c0_17 = arith.constant 0 : index
      %c0_18 = arith.constant 0 : index
      %19 = vector.load %arg5[%c0_17, %c0_18] : memref<128x64xf32, #tpu.memory_space<vmem>>, vector<128x64xf32>
      %cst_19 = arith.constant dense<0.000000e+00> : vector<16x64xf32>
      %20 = tpu.matmul %18, %19, %cst_19 {dimension_numbers = #tpu.dot_dimension_numbers<[1], [0], [0], [1], [0, 0, 1, 1], [], []>} : vector<16x128xf32>, vector<128x64xf32>, vector<16x64xf32> -> vector<16x64xf32>
      %c0_20 = arith.constant 0 : index
      %c0_21 = arith.constant 0 : index
      %21 = vector.load %arg6[%c0_20, %c0_21] : memref<1x64xf32, #tpu.memory_space<vmem>>, vector<1x64xf32>
      %22 = vector.broadcast %21 : vector<1x64xf32> to vector<16x64xf32>
      %23 = arith.addf %20, %22 : vector<16x64xf32>
      %c0_22 = arith.constant 0 : index
      %c0_23 = arith.constant 0 : index
      %24 = vector.load %arg11[%c0_22, %c0_23] : memref<16x128xf32, #tpu.memory_space<vmem>>, vector<16x32xf32>
      tpu.vector_store %arg11[%c0_22, %c0_23], %17 {strides = array<i32>} : memref<16x128xf32, #tpu.memory_space<vmem>>, vector<16x32xf32>,
      %c0_24 = arith.constant 0 : index
      %c32 = arith.constant 32 : index
      %25 = vector.load %arg11[%c0_24, %c32] : memref<16x128xf32, #tpu.memory_space<vmem>>, vector<16x64xf32>
      tpu.vector_store %arg11[%c0_24, %c32], %23 {strides = array<i32>} : memref<16x128xf32, #tpu.memory_space<vmem>>, vector<16x64xf32>,
      %c0_25 = arith.constant 0 : index
      %c0_26 = arith.constant 0 : index
      %26 = vector.load %arg11[%c0_25, %c0_26] : memref<16x128xf32, #tpu.memory_space<vmem>>, vector<16x128xf32>
      %c0_27 = arith.constant 0 : index
      %c0_28 = arith.constant 0 : index
      %27 = vector.load %arg7[%c0_27, %c0_28] : memref<128x128xf32, #tpu.memory_space<vmem>>, vector<128x128xf32>
      %cst_29 = arith.constant dense<0.000000e+00> : vector<16x128xf32>
      %28 = tpu.matmul %26, %27, %cst_29 {dimension_numbers = #tpu.dot_dimension_numbers<[1], [0], [0], [1], [0, 0, 1, 1], [], []>} : vector<16x128xf32>, vector<128x128xf32>, vector<16x128xf32> -> vector<16x128xf32>
      %c0_30 = arith.constant 0 : index
      %c0_31 = arith.constant 0 : index
      %29 = vector.load %arg8[%c0_30, %c0_31] : memref<1x128xf32, #tpu.memory_space<vmem>>, vector<1x128xf32>
      %30 = vector.broadcast %29 : vector<1x128xf32> to vector<16x128xf32>
      %31 = arith.addf %28, %30 : vector<16x128xf32>
      %c0_32 = arith.constant 0 : index
      %c0_33 = arith.constant 0 : index
      %32 = vector.load %arg9[%c0_32, %c0_33] : memref<16x128xf32, #tpu.memory_space<vmem>>, vector<16x128xf32>
      tpu.vector_store %arg9[%c0_32, %c0_33], %31 {strides = array<i32>} : memref<16x128xf32, #tpu.memory_space<vmem>>, vector<16x128xf32>,
    } else {
    }
    return
  }
  func.func @transform_0(%arg0: i32) -> (i32, i32) {
    %c0_i32 = arith.constant 0 : i32
    %c0_i32_0 = arith.constant 0 : i32
    return %c0_i32, %arg0 : i32, i32
  }
  func.func @transform_1(%arg0: i32) -> (i32, i32) {
    %c0_i32 = arith.constant 0 : i32
    %c0_i32_0 = arith.constant 0 : i32
    return %c0_i32, %arg0 : i32, i32
  }
  func.func @transform_2(%arg0: i32) -> (i32, i32) {
    %c0_i32 = arith.constant 0 : i32
    %c0_i32_0 = arith.constant 0 : i32
    %c0_i32_1 = arith.constant 0 : i32
    return %c0_i32, %c0_i32_0 : i32, i32
  }
  func.func @transform_3(%arg0: i32) -> (i32, i32) {
    %c0_i32 = arith.constant 0 : i32
    %c0_i32_0 = arith.constant 0 : i32
    %c0_i32_1 = arith.constant 0 : i32
    return %c0_i32, %c0_i32_0 : i32, i32
  }
  func.func @transform_4(%arg0: i32) -> (i32, i32) {
    %c0_i32 = arith.constant 0 : i32
    %c0_i32_0 = arith.constant 0 : i32
    %c0_i32_1 = arith.constant 0 : i32
    return %c0_i32, %c0_i32_0 : i32, i32
  }
  func.func @transform_5(%arg0: i32) -> (i32, i32) {
    %c0_i32 = arith.constant 0 : i32
    %c0_i32_0 = arith.constant 0 : i32
    %c0_i32_1 = arith.constant 0 : i32
    return %c0_i32, %c0_i32_0 : i32, i32
  }
  func.func @transform_6(%arg0: i32) -> (i32, i32) {
    %c0_i32 = arith.constant 0 : i32
    %c0_i32_0 = arith.constant 0 : i32
    %c0_i32_1 = arith.constant 0 : i32
    return %c0_i32, %c0_i32_0 : i32, i32
  }
  func.func @transform_7(%arg0: i32) -> (i32, i32) {
    %c0_i32 = arith.constant 0 : i32
    %c0_i32_0 = arith.constant 0 : i32
    %c0_i32_1 = arith.constant 0 : i32
    return %c0_i32, %c0_i32_0 : i32, i32
  }
  func.func @transform_8(%arg0: i32) -> (i32, i32) {
    %c0_i32 = arith.constant 0 : i32
    %c0_i32_0 = arith.constant 0 : i32
    %c0_i32_1 = arith.constant 0 : i32
    return %c0_i32, %c0_i32_0 : i32, i32
  }
}

</mosaic_0001>

<bundles_post_ra>
// kernel: tpu_custom_call.1
= control target key start
LH: loop header
LB: loop body
LE: loop exit
PB: predicated region body
PF: predicated region fallthrough
CT: control target
= control target key end

     0   :  { %13 = vsyncpa [#allocation5], 0  ;;  %s1140_s0 = inlined_call_operand.vmem [shape: bf16[16,1024], index: 0, kind: input, shape index: {}]   ;;  %s1141_s1 = inlined_call_operand.vmem [shape: bf16[32,1024], index: 1, kind: input, shape index: {}]   ;;  %s1142_s2 = inlined_call_operand.vmem [shape: f32[1,32], index: 2, kind: input, shape index: {}]   ;;  %s1143_s3 = inlined_call_operand.hbm [shape: f32[16,128], index: 3, kind: input, shape index: {}]   ;;  %s1144_s4 = inlined_call_operand.vmem [shape: f32[128,64], index: 4, kind: input, shape index: {}]   ;;  %s1145_s5 = inlined_call_operand.vmem [shape: f32[1,64], index: 5, kind: input, shape index: {}]   ;;  %s1146_s6 = inlined_call_operand.hbm [shape: f32[128,128], index: 6, kind: input, shape index: {}]   ;;  %s1147_s7 = inlined_call_operand.vmem [shape: f32[1,128], index: 7, kind: input, shape index: {}]   ;;  %s1148_s8 = inlined_call_operand.hbm [shape: f32[16,128], index: 8, kind: output, shape index: {}]  }
   0x1   :  { %14 = vsyncpa [#allocation8], 0 }
   0x2   :  { %15 = vsyncpa [#allocation6], 0  ;;  %s908_s27 = smov [#allocation4]   ;;  %s836_s9 = scalar_lea.hbm %s1143_s3, 256 }
   0x3   :  { %s27_s28 = sshll.u32 %s908_s27, 4  ;;  %p837_p0 = scmp.ne.s32.totalorder %s1143_s3, %s836_s9  ;;  %s28_s28 = int_to_ptr.vmem [resolvable:$true] %s27_s28 }
   0x4   :  { %p840_p1 = scmp.lt.u32.totalorder %s836_s9, %s1143_s3 }
   0x6   :  { %p842_p2 = pnand %p840_p1, %p837_p0 }
   0x8   :  { %845 = shalt.err (!%p842_p2)
}
   0x9   :  { %s846_s14 = scalar_lea.vmem %s28_s28, 256  ;;  %p851_p4 = scmp.lt.s32.totalorder %s28_s28, %s28_s28 }
   0xa   :  { %p847_p3 = scmp.ne.s32.totalorder %s28_s28, %s846_s14  ;;  %p852_p5 = scmp.lt.s32.totalorder %s846_s14, %s846_s14 }
   0xc   :  { %p853_p6 = por %p852_p5, %p851_p4 }
   0xe   :  { %p854_p7 = pnand %p853_p6, %p847_p3 }
  0x10   :  { %857 = shalt.err (!%p854_p7)
}
  0x11   :  { %s909_s15 = smov 128   ;;  %s910_s16 = smov 8  }
  0x12   :  { %33 = dma.hbm_to_vmem [thread:$0]  %s1143_s3, 256, %s28_s28, [#allocation5], %s909_s15, %s909_s15, %s910_s16  }
  0x13   :  { %s911_s19 = smov [#allocation7]   ;;  %s858_s23 = scalar_lea.hbm %s1146_s6, 2048 }
  0x14   :  { %s43_s20 = sshll.u32 %s911_s19, 4  ;;  %p859_p8 = scmp.ne.s32.totalorder %s1146_s6, %s858_s23  ;;  %s44_s20 = int_to_ptr.vmem [resolvable:$true] %s43_s20 }
  0x15   :  { %p862_p9 = scmp.lt.u32.totalorder %s858_s23, %s1146_s6 }
  0x17   :  { %p864_p10 = pnand %p862_p9, %p859_p8 }
  0x19   :  { %867 = shalt.err (!%p864_p10)
}
  0x1a   :  { %s868_s29 = scalar_lea.vmem %s44_s20, 2048  ;;  %p873_p12 = scmp.lt.s32.totalorder %s44_s20, %s44_s20 }
  0x1b   :  { %p869_p11 = scmp.ne.s32.totalorder %s44_s20, %s868_s29  ;;  %p874_p13 = scmp.lt.s32.totalorder %s868_s29, %s868_s29 }
  0x1d   :  { %p875_p0 = por %p874_p13, %p873_p12 }
  0x1f   :  { %p876_p1 = pnand %p875_p0, %p869_p11 }
  0x21   :  { %879 = shalt.err (!%p876_p1)
}
  0x22   :  { %49 = dma.hbm_to_vmem [thread:$0]  %s1146_s6, 2048, %s44_s20, [#allocation8], %s909_s15, %s909_s15, %s910_s16  }
  0x23   :  { %902 = dma.done.wait [#allocation5], 256  }
  0x24   :  { %903 = vsyncadd [#allocation5], 4294967040 }
  0x25   :  { %904 = dma.done.wait [#allocation8], 2048  }
  0x26   :  { %905 = vsyncadd [#allocation8], 4294965248  ;;  %v78_v0 = vld [vmem:[%s1141_s1] sm:$0xff]  ;;  %v79_v2 = vld [vmem:[%s1141_s1 + $0x8] sm:$0xff]  ;;  %vm63_vm0 = vcmask 261120   ;;  %s913_s21 = smov 32  }
  0x27   :  { %v82_v1 = vld [vmem:[%s1141_s1 + $0x20] sm:$0xff]  ;;  %v83_v4 = vld [vmem:[%s1141_s1 + $0x28] sm:$0xff]  ;;  %v80_v20 = vld [vmem:[%s1141_s1 + $0x10] sm:$0xff]  ;;  %vm509_vm1 = vcmask 785664  }
  0x28   :  { %v641_v3 = vcombine.high %v78_v0, %v82_v1  ;;  %v640_v5 = vcombine.low %v78_v0, %v82_v1  ;;  %v86_v6 = vld [vmem:[%s1141_s1 + $0x40] sm:$0xff]  ;;  %v643_v8 = vcombine.high %v79_v2, %v83_v4  ;;  %v642_v9 = vcombine.low %v79_v2, %v83_v4  ;;  %v87_v11 = vld [vmem:[%s1141_s1 + $0x48] sm:$0xff]  ;;  %v84_v21 = vld [vmem:[%s1141_s1 + $0x30] sm:$0xff] }
  0x29   :  { %v90_v7 = vld [vmem:[%s1141_s1 + $0x60] sm:$0xff]  ;;  %v91_v12 = vld [vmem:[%s1141_s1 + $0x68] sm:$0xff]  ;;  %v81_v22 = vld [vmem:[%s1141_s1 + $0x18] sm:$0xff]  ;;  %v645_v26 = vcombine.high %v80_v20, %v84_v21  ;;  %v644_v36 = vcombine.low %v80_v20, %v84_v21 }
  0x2a   :  { %v649_v10 = vcombine.high %v86_v6, %v90_v7  ;;  %v70_v13 = vld [vmem:[%s1140_s0] sm:$0xff]  ;;  %214 = vmatprep.subr.bf16.mxu0 %v641_v3  ;;  %v651_v14 = vcombine.high %v87_v11, %v91_v12  ;;  %v71_v16 = vld [vmem:[%s1140_s0 + $0x8] sm:$0xff]  ;;  %255 = vmatprep.subr.bf16.mxu1 %v643_v8  ;;  %v85_v23 = vld [vmem:[%s1141_s1 + $0x38] sm:$0xff]  ;;  %v648_v24 = vcombine.low %v86_v6, %v90_v7 }
  0x2b   :  { %v74_v15 = vld [vmem:[%s1140_s0 + $0x20] sm:$0xff]  ;;  %v75_v17 = vld [vmem:[%s1140_s0 + $0x28] sm:$0xff]  ;;  %215 = vmatpush1.bf16.xpose.msra.mxu0 %v640_v5  ;;  %256 = vmatpush1.bf16.xpose.msra.mxu1 %v642_v9  ;;  %v650_v25 = vcombine.low %v87_v11, %v91_v12  ;;  %v647_v27 = vcombine.high %v81_v22, %v85_v23  ;;  %v88_v28 = vld [vmem:[%s1141_s1 + $0x50] sm:$0xff]  ;;  %v646_v39 = vcombine.low %v81_v22, %v85_v23 }
  0x2c   :  { %v633_v18 = vcombine.high %v70_v13, %v74_v15  ;;  %216 = vmatprep.subr.bf16.mxu0 %v649_v10  ;;  %v635_v19 = vcombine.high %v71_v16, %v75_v17  ;;  %257 = vmatprep.subr.bf16.mxu1 %v651_v14  ;;  %v92_v29 = vld [vmem:[%s1141_s1 + $0x70] sm:$0xff]  ;;  %v89_v30 = vld [vmem:[%s1141_s1 + $0x58] sm:$0xff]  ;;  %v632_v31 = vcombine.low %v70_v13, %v74_v15  ;;  %v401_v44 = vld [vmem:[%s1144_s4] sm:$0xff]  ;;  %v912_v10 = vmov 0.0  }
  0x2d   :  { %v93_v32 = vld [vmem:[%s1141_s1 + $0x78] sm:$0xff]  ;;  %v72_v33 = vld [vmem:[%s1140_s0 + $0x10] sm:$0xff]  ;;  %v634_v35 = vcombine.low %v71_v16, %v75_v17  ;;  %v653_v40 = vcombine.high %v88_v28, %v92_v29  ;;  %v402_v45 = vld [vmem:[%s1144_s4 + $0x8] sm:$0xff]  ;;  %v652_v46 = vcombine.low %v88_v28, %v92_v29  ;;  %64 = vst.msk [vmem:[#allocation2] sm:$0xff] %vm63_vm0, %v912_v10 }
  0x2e   :  { %246 = vmatprep.mubr.bf16.mxu0 %v633_v18  ;;  %287 = vmatprep.mubr.bf16.mxu1 %v635_v19  ;;  %v76_v34 = vld [vmem:[%s1140_s0 + $0x30] sm:$0xff]  ;;  %v73_v37 = vld [vmem:[%s1140_s0 + $0x18] sm:$0xff]  ;;  %v655_v41 = vcombine.high %v89_v30, %v93_v32  ;;  %v654_v47 = vcombine.low %v89_v30, %v93_v32  ;;  %v765_v48 = vpack.c.bf16 %v402_v45, %v401_v44  ;;  %v405_v54 = vld [vmem:[%s1144_s4 + $0x20] sm:$0xff] }
  0x2f   :  { %v77_v38 = vld [vmem:[%s1140_s0 + $0x38] sm:$0xff]  ;;  %v637_v42 = vcombine.high %v72_v33, %v76_v34  ;;  %v403_v49 = vld [vmem:[%s1144_s4 + $0x10] sm:$0xff]  ;;  %v636_v51 = vcombine.low %v72_v33, %v76_v34  ;;  %v406_v55 = vld [vmem:[%s1144_s4 + $0x28] sm:$0xff]  ;;  %65 = vst.msk [vmem:[#allocation2 + $0x8] sm:$0xff] %vm63_vm0, %v912_v10 }
  0x30   :  { %v639_v43 = vcombine.high %v73_v37, %v77_v38  ;;  %v404_v50 = vld [vmem:[%s1144_s4 + $0x18] sm:$0xff]  ;;  %v638_v52 = vcombine.low %v73_v37, %v77_v38  ;;  %v399_v56 = vld [vmem:[#allocation4] sm:$0xff]  ;;  %v773_v57 = vpack.c.bf16 %v406_v55, %v405_v54  ;;  %v407_v58 = vld [vmem:[%s1144_s4 + $0x30] sm:$0xff]  ;;  %66 = vst [vmem:[#allocation3] sm:$0xff] %v912_v10 }
  0x31   :  { %v769_v53 = vpack.c.bf16 %v404_v50, %v403_v49  ;;  %v408_v59 = vld [vmem:[%s1144_s4 + $0x38] sm:$0xff]  ;;  %v409_v61 = vld [vmem:[%s1144_s4 + $0x40] sm:$0xff]  ;;  %v410_v62 = vld [vmem:[%s1144_s4 + $0x48] sm:$0xff]  ;;  %67 = vst [vmem:[#allocation3 + $0x8] sm:$0xff] %v912_v10 }
  0x32   :  { %v777_v60 = vpack.c.bf16 %v408_v59, %v407_v58  ;;  %v781_v63 = vpack.c.bf16 %v410_v62, %v409_v61  ;;  %v411_v0 = vld [vmem:[%s1144_s4 + $0x50] sm:$0xff]  ;;  %v412_v1 = vld [vmem:[%s1144_s4 + $0x58] sm:$0xff]  ;;  %v413_v3 = vld [vmem:[%s1144_s4 + $0x60] sm:$0xff] }
  0x33   :  { %217 = vmatpush1.bf16.xpose.msra.mxu0 %v648_v24  ;;  %258 = vmatpush1.bf16.xpose.msra.mxu1 %v650_v25  ;;  %v785_v2 = vpack.c.bf16 %v412_v1, %v411_v0  ;;  %v414_v4 = vld [vmem:[%s1144_s4 + $0x68] sm:$0xff]  ;;  %v415_v6 = vld [vmem:[%s1144_s4 + $0x70] sm:$0xff]  ;;  %v416_v7 = vld [vmem:[%s1144_s4 + $0x78] sm:$0xff] }
  0x34   :  { %296 = vmatprep.subr.bf16.mxu0 %v645_v26  ;;  %337 = vmatprep.subr.bf16.mxu1 %v647_v27  ;;  %v789_v5 = vpack.c.bf16 %v414_v4, %v413_v3  ;;  %v793_v8 = vpack.c.bf16 %v416_v7, %v415_v6  ;;  %v400_v9 = vld [vmem:[#allocation4 + $0x8] sm:$0xff]  ;;  %v514_v11 = vld [vmem:[#allocation7] sm:$0xff]  ;;  %v515_v12 = vld [vmem:[#allocation7 + $0x8] sm:$0xff] }
  0x35   :  { %v516_v13 = vld [vmem:[#allocation7 + $0x10] sm:$0xff]  ;;  %v797_v14 = vpack.c.bf16 %v515_v12, %v514_v11  ;;  %v517_v15 = vld [vmem:[#allocation7 + $0x18] sm:$0xff]  ;;  %v518_v17 = vld [vmem:[#allocation7 + $0x20] sm:$0xff] }
  0x36   :  { %v801_v16 = vpack.c.bf16 %v517_v15, %v516_v13  ;;  %v519_v18 = vld [vmem:[#allocation7 + $0x28] sm:$0xff]  ;;  %v520_v20 = vld [vmem:[#allocation7 + $0x30] sm:$0xff]  ;;  %v521_v21 = vld [vmem:[#allocation7 + $0x38] sm:$0xff] }
  0x37   :  { %v805_v19 = vpack.c.bf16 %v519_v18, %v518_v17  ;;  %v809_v22 = vpack.c.bf16 %v521_v21, %v520_v20  ;;  %v522_v23 = vld [vmem:[#allocation7 + $0x40] sm:$0xff]  ;;  %v523_v24 = vld [vmem:[#allocation7 + $0x48] sm:$0xff]  ;;  %v524_v59 = vld [vmem:[#allocation7 + $0x50] sm:$0xff] }
  0x38   :  { %v813_v25 = vpack.c.bf16 %v523_v24, %v522_v23  ;;  %v526_v62 = vld [vmem:[#allocation7 + $0x60] sm:$0xff]  ;;  %v528_v1 = vld [vmem:[#allocation7 + $0x70] sm:$0xff] }
  0x39   :  { %v657_v4 = vld [vmem:[%s1145_s5] ss:$0 sm:$0xff]  ;;  %s914_s5 = smov [#allocation9]  }
  0x3a   :  { %247 = vmatmul.mubr.bf16.vlgmr.msra.gmra.mrb[0].mxu0 %v632_v31  ;;  %288 = vmatmul.mubr.bf16.vlgmr.msra.gmra.mrb[0].mxu1 %v634_v35  ;;  %v658_v13 = vld [vmem:[%s1147_s7] ss:$0 sm:$0xff]  ;;  %s619_s24 = sshll.u32 %s914_s5, 4  ;;  %s620_s24 = int_to_ptr.vmem [resolvable:$true] %s619_s24 }
  0x3b   :  { %297 = vmatpush1.bf16.xpose.msra.mxu0 %v644_v36  ;;  %338 = vmatpush1.bf16.xpose.msra.mxu1 %v646_v39  ;;  %s880_s25 = scalar_lea.vmem %s620_s24, 256  ;;  %p885_p3 = scmp.lt.s32.totalorder %s620_s24, %s620_s24 }
  0x3c   :  { %298 = vmatprep.subr.bf16.mxu0 %v653_v40  ;;  %339 = vmatprep.subr.bf16.mxu1 %v655_v41  ;;  %v68_v41 = vld [vmem:[#allocation2] sm:$0xff]  ;;  %p881_p2 = scmp.ne.s32.totalorder %s620_s24, %s880_s25  ;;  %p886_p4 = scmp.lt.s32.totalorder %s880_s25, %s880_s25 }
  0x3d   :  { %328 = vmatprep.mubr.bf16.mxu0 %v637_v42  ;;  %369 = vmatprep.mubr.bf16.mxu1 %v639_v43 }
  0x3e   :  { %p887_p5 = por %p886_p4, %p885_p3 }
  0x40   :  { %p888_p6 = pnand %p887_p5, %p881_p2 }
  0x43   :  { %299 = vmatpush1.bf16.xpose.msra.mxu0 %v652_v46  ;;  %340 = vmatpush1.bf16.xpose.msra.mxu1 %v654_v47  ;;  %v69_v47 = vld [vmem:[#allocation2 + $0x8] sm:$0xff] }
  0x44   :  { %766 = vmatprep.subr.bf16.mxu0 %v765_v48  ;;  %798 = vmatprep.subr.bf16.mxu1 %v797_v14 }
  0x4a   :  { %329 = vmatmul.mubr.bf16.vlgmr.msra.gmra.mrb[4].mxu0 %v636_v51  ;;  %370 = vmatmul.mubr.bf16.vlgmr.msra.gmra.mrb[4].mxu1 %v638_v52  ;;  %v656_v52 = vld [vmem:[%s1142_s2] ss:$0 sm:$0xff] }
  0x4b   :  { %768 = vmatpush3.bf16.msra.mxu0 %v765_v48  ;;  %727 = vmatprep.mubr.f32.mxu0 %v399_v56 }
  0x4c   :  { %770 = vmatprep.subr.bf16.mxu0 %v769_v53  ;;  %800 = vmatpush3.bf16.msra.mxu1 %v797_v14 }
  0x4d   :  { %802 = vmatprep.subr.bf16.mxu1 %v801_v16 }
  0x4f   :  { %772 = vmatpush3.bf16.msra.mxu0 %v769_v53 }
  0x50   :  { %774 = vmatprep.subr.bf16.mxu0 %v773_v57  ;;  %804 = vmatpush3.bf16.msra.mxu1 %v801_v16 }
  0x51   :  { %806 = vmatprep.subr.bf16.mxu1 %v805_v19 }
  0x53   :  { %776 = vmatpush3.bf16.msra.mxu0 %v773_v57 }
  0x54   :  { %778 = vmatprep.subr.bf16.mxu0 %v777_v60  ;;  %808 = vmatpush3.bf16.msra.mxu1 %v805_v19 }
  0x55   :  { %810 = vmatprep.subr.bf16.mxu1 %v809_v22 }
  0x57   :  { %780 = vmatpush3.bf16.msra.mxu0 %v777_v60  ;;  %v525_v60 = vld [vmem:[#allocation7 + $0x58] sm:$0xff] }
  0x58   :  { %782 = vmatprep.subr.bf16.mxu0 %v781_v63  ;;  %812 = vmatpush3.bf16.msra.mxu1 %v809_v22  ;;  %v817_v61 = vpack.c.bf16 %v525_v60, %v524_v59 }
  0x59   :  { %814 = vmatprep.subr.bf16.mxu1 %v813_v25 }
  0x5b   :  { %784 = vmatpush3.bf16.msra.mxu0 %v781_v63  ;;  %v527_v63 = vld [vmem:[#allocation7 + $0x68] sm:$0xff] }
  0x5c   :  { %786 = vmatprep.subr.bf16.mxu0 %v785_v2  ;;  %816 = vmatpush3.bf16.msra.mxu1 %v813_v25  ;;  %v821_v0 = vpack.c.bf16 %v527_v63, %v526_v62 }
  0x5d   :  { %818 = vmatprep.subr.bf16.mxu1 %v817_v61 }
  0x5f   :  { %788 = vmatpush3.bf16.msra.mxu0 %v785_v2  ;;  %v529_v2 = vld [vmem:[#allocation7 + $0x78] sm:$0xff] }
  0x60   :  { %790 = vmatprep.subr.bf16.mxu0 %v789_v5  ;;  %820 = vmatpush3.bf16.msra.mxu1 %v817_v61  ;;  %v825_v3 = vpack.c.bf16 %v529_v2, %v528_v1 }
  0x61   :  { %822 = vmatprep.subr.bf16.mxu1 %v821_v0 }
  0x63   :  { %792 = vmatpush3.bf16.msra.mxu0 %v789_v5 }
  0x64   :  { %794 = vmatprep.subr.bf16.mxu0 %v793_v8  ;;  %824 = vmatpush3.bf16.msra.mxu1 %v821_v0 }
  0x65   :  { %826 = vmatprep.subr.bf16.mxu1 %v825_v3 }
  0x67   :  { %796 = vmatpush3.bf16.msra.mxu0 %v793_v8 }
  0x68   :  { %828 = vmatpush3.bf16.msra.mxu1 %v825_v3 }
  0x6a   :  { %728 = vmatmul.mubr.f32.vlgmr.msra.gmra.mrb[8].mxu0 %v400_v9 }
 0x10d   :  { %v248_v26 = vpop.f32.mrb[0].mxu0  ;;  %v289_v27 = vpop.f32.mrb[0].mxu1 }
 0x10e   :  { %v250_v28 = vpop.f32.mrb[1].mxu0  ;;  %v290_v29 = vadd.f32 %v289_v27, %v248_v26  ;;  %v291_v30 = vpop.f32.mrb[1].mxu1 }
 0x10f   :  { %v251_v31 = vpop.f32.mrb[2].mxu0  ;;  %v292_v32 = vpop.f32.mrb[2].mxu1 }
 0x110   :  { %v253_v33 = vpop.f32.mrb[3].mxu0  ;;  %v293_v34 = vadd.f32 %v292_v32, %v251_v31  ;;  %v294_v35 = vpop.f32.mrb[3].mxu1 }
 0x11d   :  { %v330_v36 = vpop.f32.mrb[4].mxu0  ;;  %v371_v39 = vpop.f32.mrb[4].mxu1 }
 0x11e   :  { %v331_v37 = vadd.f32 %v330_v36, %v290_v29  ;;  %v332_v38 = vpop.f32.mrb[5].mxu0  ;;  %v373_v42 = vpop.f32.mrb[5].mxu1 }
 0x11f   :  { %v333_v40 = vpop.f32.mrb[6].mxu0  ;;  %v374_v46 = vpop.f32.mrb[6].mxu1 }
 0x120   :  { %v334_v43 = vadd.f32 %v333_v40, %v293_v34  ;;  %v372_v44 = vadd.f32 %v371_v39, %v331_v37  ;;  %v335_v45 = vpop.f32.mrb[7].mxu0  ;;  %v376_v48 = vpop.f32.mrb[7].mxu1 }
 0x122   :  { %v378_v49 = vadd.f32 %v372_v44, %v68_v41  ;;  %v375_v50 = vadd.f32 %v374_v46, %v334_v43 }
 0x124   :  { %381 = vst.msk [vmem:[#allocation2] sm:$0xff] %vm63_vm0, %v378_v49  ;;  %v379_v51 = vadd.f32 %v375_v50, %v69_v47 }
 0x126   :  { %382 = vst.msk [vmem:[#allocation2 + $0x8] sm:$0xff] %vm63_vm0, %v379_v51 }
 0x12b   :  { %v386_v53 = vld [vmem:[#allocation2] sm:$0xff] }
 0x12c   :  { %v395_v54 = vadd.f32 %v656_v52, %v386_v53 }
 0x12d   :  { %v387_v55 = vld [vmem:[#allocation2 + $0x8] sm:$0xff] }
 0x12e   :  { %v397_v56 = vmax.f32 %v395_v54, 0.0  ;;  %v396_v57 = vadd.f32 %v656_v52, %v387_v55 }
 0x130   :  { %499 = vst.msk [vmem:[#allocation3] sm:$0xff] %vm63_vm0, %v397_v56  ;;  %v398_v58 = vmax.f32 %v396_v57, 0.0 }
 0x132   :  { %500 = vst.msk [vmem:[#allocation3 + $0x8] sm:$0xff] %vm63_vm0, %v398_v58 }
 0x13d   :  { %v729_v5 = vpop.f32.mrb[8].mxu0 }
 0x13e   :  { %v490_v6 = vpop.f32.mrb[9].mxu0  ;;  %v496_v8 = vadd.f32 %v729_v5, %v657_v4 }
 0x13f   :  { %v491_v7 = vadd.f32 %v657_v4, %v490_v6 }
 0x141   :  { %503 = vrot.lane.b32.xlu0 %v491_v7, %s913_s21 }
 0x145   :  { %505 = vrot.lane.b32.xlu0 %v496_v8, %s913_s21 }
 0x1b3   :  { %v504_v9 = vpop.permute.xlu0 %503 }
 0x1b4   :  { %510 = vst.msk [vmem:[#allocation3] sm:$0xff] %vm509_vm1, %v504_v9 }
 0x1b7   :  { %v506_v10 = vpop.permute.xlu0 %505 }
 0x1b8   :  { %511 = vst.msk [vmem:[#allocation3 + $0x8] sm:$0xff] %vm509_vm1, %v506_v10 }
 0x1bb   :  { %v512_v11 = vld [vmem:[#allocation3] sm:$0xff] }
 0x1bc   :  { %762 = vmatprep.mubr.f32.mxu1 %v512_v11 }
 0x1bf   :  { %v513_v12 = vld [vmem:[#allocation3 + $0x8] sm:$0xff] }
 0x1c0   :  { %763 = vmatmul.mubr.f32.vlgmr.msra.gmra.mrb[8].mxu1 %v513_v12 }
 0x293   :  { %v764_v14 = vpop.f32.mrb[8].mxu1 }
 0x294   :  { %v609_v15 = vadd.f32 %v764_v14, %v658_v13  ;;  %v603_v16 = vpop.f32.mrb[9].mxu1 }
 0x295   :  { %v604_v17 = vadd.f32 %v658_v13, %v603_v16 }
 0x296   :  { %613 = vst [vmem:[#allocation9 + $0x8] sm:$0xff] %v609_v15 }
 0x297   :  { %612 = vst [vmem:[#allocation9] sm:$0xff] %v604_v17 }
 0x298   :  { %891 = shalt.err (!%p888_p6)
}
 0x299   :  { %s892_s7 = scalar_lea.hbm %s1148_s8, 256 }
 0x29a   :  { %p893_p7 = scmp.ne.s32.totalorder %s1148_s8, %s892_s7  ;;  %p896_p8 = scmp.lt.u32.totalorder %s892_s7, %s1148_s8 }
 0x29c   :  { %p898_p9 = pnand %p896_p8, %p893_p7 }
 0x29e   :  { %901 = shalt.err (!%p898_p9)
}
 0x29f   :  { %625 = dma.vmem_to_hbm [thread:$0]  %s620_s24, 256, %s1148_s8, [#allocation6], %s909_s15, %s909_s15, %s910_s16  }
 0x2a0   :  { %906 = dma.done.wait [#allocation6], 256  }
 0x2a1   :  { %907 = vsyncadd [#allocation6], 4294967040 }
 0x2a2   :  { %629 = vsyncpa [#allocation5], 1 }
 0x2a3   :  { %630 = vsyncpa [#allocation8], 1 }
 0x2a4   :  { %631 = vsyncpa [#allocation6], 1 }

</bundles_post_ra>
